<compile_context>
chip_gen: v7x
topology: tpu7x:2x2x1
jax: 0.10.0
libtpu: 0.0.40
codegen_flags: <defaults>
</compile_context>

<pallas_src>
import functools

import jax
import jax.numpy as jnp
import numpy as np
from jax.experimental import pallas as pl
from jax.experimental.pallas import tpu as pltpu


def _gennorm_kernel(x_ref, rm_ref, rv_ref, w_ref, b_ref,
                    y_ref, nrm_ref, nrv_ref, *, beta, eps, affine):
    # x_ref: (N, TC, L); per-channel (sublane-row) reduction over axes (0, 2).
    x = x_ref[...].astype(jnp.float32)
    n, tc, l = x.shape
    m = n * l  # reduction size per channel
    # TODO(synk): m == 1 yields inf/NaN from the unbiased (ddof=1) variance,
    # exactly like torch.var; left unguarded to keep semantics identical.

    rm = rm_ref[...]                       # (TC, 1) f32
    rv = rv_ref[...]                       # (TC, 1) f32

    # --- track(): single-pass shifted sum / sum-of-squares (shift = running
    # mean, which is usually close to the data mean -> limits cancellation).
    xs = x - rm[None, :, :]                          # (N, TC, L)
    part_s = jnp.sum(xs, axis=0)                     # (TC, L) adds over N
    part_q = jnp.sum(xs * xs, axis=0)                # (TC, L)
    s = jnp.sum(part_s, axis=1, keepdims=True)       # (TC, 1) lane reduce
    q = jnp.sum(part_q, axis=1, keepdims=True)       # (TC, 1)

    mean_s = s / m                                   # = mean - rm
    var = (q - m * mean_s * mean_s) / (m - 1)        # unbiased, ddof=1
    mean = mean_s + rm

    new_rm = rm + beta * (mean - rm)
    new_rv = rv + beta * (var - rv)

    # --- normalize() with the *updated* running stats, folded to one
    # per-element multiply-add: y = x * scale + offset.
    inv = jax.lax.rsqrt(new_rv + eps)                # (TC, 1)
    scale = inv
    offset = -new_rm * inv
    if affine:
        w = w_ref[...]
        scale = scale * w
        offset = offset * w + b_ref[...]

    y_ref[...] = (x * scale[None, :, :] + offset[None, :, :]).astype(y_ref.dtype)
    nrm_ref[...] = new_rm
    nrv_ref[...] = new_rv


def _choose_channel_tile(c, n, l, itemsize, budget_bytes=2 << 20):
    """Largest channel tile whose (N, TC, L) x-block fits the VMEM budget.

    Legal tiles: TC == C (full channel dim, always layout-legal) or a
    multiple of 8 that divides C (keeps the (8,128) rule, no tail masking).
    """
    per_channel = n * l * itemsize
    cands = {c} | {d for d in range(8, c, 8) if c % d == 0}
    fitting = [d for d in cands if d * per_channel <= budget_bytes]
    if fitting:
        return max(fitting)
    return min(cands)  # nothing fits the budget: use the smallest legal tile


def gennorm_forward(x, running_mean, running_var, weight, bias,
                    beta=0.1, eps=1e-9, affine=True, channel_tile=None):
    """Forward of GenNorm.

    Args:
      x: (N, C, ...) array (e.g. NCHW), any float dtype.
      running_mean, running_var, weight, bias: (C,) float32.
    Returns:
      y: same shape/dtype as x, new_running_mean (C,), new_running_var (C,).
    """
    orig_shape = x.shape
    n, c = x.shape[0], x.shape[1]
    l = int(np.prod(x.shape[2:])) if x.ndim > 2 else 1

    # Pure view reshape (no transpose, no HBM copy): NCHW -> (N, C, L).
    x3 = x.reshape(n, c, l)

    rm = running_mean.reshape(c, 1).astype(jnp.float32)
    rv = running_var.reshape(c, 1).astype(jnp.float32)
    w = weight.reshape(c, 1).astype(jnp.float32)
    b = bias.reshape(c, 1).astype(jnp.float32)

    itemsize = jnp.dtype(x.dtype).itemsize
    if channel_tile is None:
        tc = _choose_channel_tile(c, n, l, itemsize)
    else:
        tc = channel_tile
        assert c % tc == 0 and (tc == c or tc % 8 == 0), "illegal channel tile"
    grid = (c // tc,)

    kernel = functools.partial(_gennorm_kernel, beta=beta, eps=eps, affine=affine)

    x_spec = pl.BlockSpec((n, tc, l), lambda i: (0, i, 0))
    col_spec = pl.BlockSpec((tc, 1), lambda i: (i, 0))

    y3, new_rm, new_rv = pl.pallas_call(
        kernel,
        grid=grid,
        in_specs=[x_spec, col_spec, col_spec, col_spec, col_spec],
        out_specs=(x_spec, col_spec, col_spec),
        out_shape=(
            jax.ShapeDtypeStruct((n, c, l), x.dtype),
            jax.ShapeDtypeStruct((c, 1), jnp.float32),
            jax.ShapeDtypeStruct((c, 1), jnp.float32),
        ),
        compiler_params=pltpu.CompilerParams(
            dimension_semantics=("parallel",)),
    )(x3, rm, rv, w, b)

    return y3.reshape(orig_shape), new_rm.reshape(c), new_rv.reshape(c)


def _reference(x, rm, rv, w, b, beta=0.1, eps=1e-9, affine=True):
    n, c = x.shape[0], x.shape[1]
    x3 = x.reshape(n, c, -1).astype(jnp.float32)
    mean = x3.mean(axis=(0, 2))
    var = x3.var(axis=(0, 2), ddof=1)  # torch.var default: unbiased
    new_rm = rm + beta * (mean - rm)
    new_rv = rv + beta * (var - rv)
    res = (x3 - new_rm[None, :, None]) / jnp.sqrt(new_rv[None, :, None] + eps)
    if affine:
        res = res * w[None, :, None] + b[None, :, None]
    return res.reshape(x.shape), new_rm, new_rv


def _check(x, rm0, rv0, w, b, **kw):
    y, nrm, nrv = gennorm_forward(x, rm0, rv0, w, b, **kw)
    jax.block_until_ready((y, nrm, nrv))
    kw.pop("channel_tile", None)
    y_ref, rm_ref, rv_ref = _reference(x, rm0, rv0, w, b, **kw)
    assert y.shape == x.shape and y.dtype == x.dtype
    np.testing.assert_allclose(np.asarray(y), np.asarray(y_ref), rtol=1e-5, atol=1e-5)
    np.testing.assert_allclose(np.asarray(nrm), np.asarray(rm_ref), rtol=1e-5, atol=1e-6)
    np.testing.assert_allclose(np.asarray(nrv), np.asarray(rv_ref), rtol=1e-5, atol=1e-6)


if __name__ == "__main__":
    key = jax.random.PRNGKey(0)

    # Case 1: module-sized example (N, C, H, W) = (2, 4, 16, 16); single tile.
    N, C, H, W = 2, 4, 16, 16
    x = jax.random.normal(key, (N, C, H, W), dtype=jnp.float32)
    running_mean = jnp.zeros((C,), jnp.float32)   # GenNorm.__init__(n=C) buffers
    running_var = jnp.ones((C,), jnp.float32)
    weight = jnp.ones((C,), jnp.float32)          # non-trivial params below
    bias = jnp.zeros((C,), jnp.float32)
    _check(x, running_mean, running_var, weight, bias,
           beta=0.1, eps=1e-9, affine=True)

    # Case 2: exercise the channel-tiled grid (grid length 2, "parallel" axis).
    key2 = jax.random.PRNGKey(0)
    N2, C2, H2, W2 = 2, 16, 8, 8
    x2 = 0.5 + 1.5 * jax.random.normal(key2, (N2, C2, H2, W2), dtype=jnp.float32)
    rm2 = 0.1 * jnp.arange(C2, dtype=jnp.float32)
    rv2 = 1.0 + 0.05 * jnp.arange(C2, dtype=jnp.float32)
    w2 = 1.0 + 0.01 * jnp.arange(C2, dtype=jnp.float32)
    b2 = -0.02 * jnp.arange(C2, dtype=jnp.float32)
    _check(x2, rm2, rv2, w2, b2, beta=0.1, eps=1e-9, affine=True, channel_tile=8)

    print("KERNEL_OK")
</pallas_src>

<mosaic_0001>
module attributes {stable_mosaic.version = 11 : i64} {
  func.func @_gennorm_kernel(%arg0: i32, %arg1: memref<2x4x256xf32, #tpu.memory_space<vmem>>, %arg2: memref<4x1xf32, #tpu.memory_space<vmem>>, %arg3: memref<4x1xf32, #tpu.memory_space<vmem>>, %arg4: memref<4x1xf32, #tpu.memory_space<vmem>>, %arg5: memref<4x1xf32, #tpu.memory_space<vmem>>, %arg6: memref<2x4x256xf32, #tpu.memory_space<vmem>>, %arg7: memref<4x1xf32, #tpu.memory_space<vmem>>, %arg8: memref<4x1xf32, #tpu.memory_space<vmem>>) attributes {dimension_semantics = [#tpu.dimension_semantics<parallel>], iteration_bounds = array<i64: 1>, scalar_prefetch = 0 : i64, scratch_operands = 0 : i64, tpu.core_type = #tpu.core_type<tc>, window_params = [{transform_indices = @transform_0, window_bounds = array<i64: 2, 4, 256>}, {transform_indices = @transform_1, window_bounds = array<i64: 4, 1>}, {transform_indices = @transform_2, window_bounds = array<i64: 4, 1>}, {transform_indices = @transform_3, window_bounds = array<i64: 4, 1>}, {transform_indices = @transform_4, window_bounds = array<i64: 4, 1>}, {transform_indices = @transform_5, window_bounds = array<i64: 2, 4, 256>}, {transform_indices = @transform_6, window_bounds = array<i64: 4, 1>}, {transform_indices = @transform_7, window_bounds = array<i64: 4, 1>}]} {
    %c0 = arith.constant 0 : index
    %c0_0 = arith.constant 0 : index
    %c0_1 = arith.constant 0 : index
    %0 = vector.load %arg1[%c0, %c0_0, %c0_1] : memref<2x4x256xf32, #tpu.memory_space<vmem>>, vector<2x4x256xf32>
    %c0_2 = arith.constant 0 : index
    %c0_3 = arith.constant 0 : index
    %1 = vector.load %arg2[%c0_2, %c0_3] : memref<4x1xf32, #tpu.memory_space<vmem>>, vector<4x1xf32>
    %c0_4 = arith.constant 0 : index
    %c0_5 = arith.constant 0 : index
    %2 = vector.load %arg3[%c0_4, %c0_5] : memref<4x1xf32, #tpu.memory_space<vmem>>, vector<4x1xf32>
    %3 = vector.shape_cast %1 : vector<4x1xf32> to vector<1x4x1xf32>
    %4 = vector.broadcast %3 : vector<1x4x1xf32> to vector<2x4x256xf32>
    %5 = arith.subf %0, %4 : vector<2x4x256xf32>
    %cst = arith.constant dense<0.000000e+00> : vector<4x256xf32>
    %6 = vector.multi_reduction <add>, %5, %cst [0] : vector<2x4x256xf32> to vector<4x256xf32>
    %7 = arith.mulf %5, %5 : vector<2x4x256xf32>
    %cst_6 = arith.constant dense<0.000000e+00> : vector<4x256xf32>
    %8 = vector.multi_reduction <add>, %7, %cst_6 [0] : vector<2x4x256xf32> to vector<4x256xf32>
    %cst_7 = arith.constant dense<0.000000e+00> : vector<4xf32>
    %9 = vector.multi_reduction <add>, %6, %cst_7 [1] : vector<4x256xf32> to vector<4xf32>
    %10 = vector.shape_cast %9 : vector<4xf32> to vector<4x1xf32>
    %cst_8 = arith.constant dense<0.000000e+00> : vector<4xf32>
    %11 = vector.multi_reduction <add>, %8, %cst_8 [1] : vector<4x256xf32> to vector<4xf32>
    %12 = vector.shape_cast %11 : vector<4xf32> to vector<4x1xf32>
    %cst_9 = arith.constant 5.120000e+02 : f32
    %13 = vector.broadcast %cst_9 : f32 to vector<4x1xf32>
    %14 = arith.divf %10, %13 : vector<4x1xf32>
    %cst_10 = arith.constant 5.120000e+02 : f32
    %15 = vector.broadcast %cst_10 : f32 to vector<4x1xf32>
    %16 = arith.mulf %15, %14 : vector<4x1xf32>
    %17 = arith.mulf %16, %14 : vector<4x1xf32>
    %18 = arith.subf %12, %17 : vector<4x1xf32>
    %cst_11 = arith.constant 5.110000e+02 : f32
    %19 = vector.broadcast %cst_11 : f32 to vector<4x1xf32>
    %20 = arith.divf %18, %19 : vector<4x1xf32>
    %21 = arith.addf %14, %1 : vector<4x1xf32>
    %22 = arith.subf %21, %1 : vector<4x1xf32>
    %cst_12 = arith.constant 1.000000e-01 : f32
    %23 = vector.broadcast %cst_12 : f32 to vector<4x1xf32>
    %24 = arith.mulf %23, %22 : vector<4x1xf32>
    %25 = arith.addf %1, %24 : vector<4x1xf32>
    %26 = arith.subf %20, %2 : vector<4x1xf32>
    %cst_13 = arith.constant 1.000000e-01 : f32
    %27 = vector.broadcast %cst_13 : f32 to vector<4x1xf32>
    %28 = arith.mulf %27, %26 : vector<4x1xf32>
    %29 = arith.addf %2, %28 : vector<4x1xf32>
    %cst_14 = arith.constant 9.99999971E-10 : f32
    %30 = vector.broadcast %cst_14 : f32 to vector<4x1xf32>
    %31 = arith.addf %29, %30 : vector<4x1xf32>
    %32 = math.rsqrt %31 : vector<4x1xf32>
    %cst_15 = arith.constant 0.000000e+00 : f32
    %33 = vector.broadcast %cst_15 : f32 to vector<4x1xf32>
    %34 = arith.subf %33, %25 : vector<4x1xf32>
    %35 = arith.mulf %34, %32 : vector<4x1xf32>
    %c0_16 = arith.constant 0 : index
    %c0_17 = arith.constant 0 : index
    %36 = vector.load %arg4[%c0_16, %c0_17] : memref<4x1xf32, #tpu.memory_space<vmem>>, vector<4x1xf32>
    %37 = arith.mulf %32, %36 : vector<4x1xf32>
    %38 = arith.mulf %35, %36 : vector<4x1xf32>
    %c0_18 = arith.constant 0 : index
    %c0_19 = arith.constant 0 : index
    %39 = vector.load %arg5[%c0_18, %c0_19] : memref<4x1xf32, #tpu.memory_space<vmem>>, vector<4x1xf32>
    %40 = arith.addf %38, %39 : vector<4x1xf32>
    %41 = vector.shape_cast %37 : vector<4x1xf32> to vector<1x4x1xf32>
    %42 = vector.broadcast %41 : vector<1x4x1xf32> to vector<2x4x256xf32>
    %43 = arith.mulf %0, %42 : vector<2x4x256xf32>
    %44 = vector.shape_cast %40 : vector<4x1xf32> to vector<1x4x1xf32>
    %45 = vector.broadcast %44 : vector<1x4x1xf32> to vector<2x4x256xf32>
    %46 = arith.addf %43, %45 : vector<2x4x256xf32>
    %c0_20 = arith.constant 0 : index
    %c0_21 = arith.constant 0 : index
    %c0_22 = arith.constant 0 : index
    %47 = vector.load %arg6[%c0_20, %c0_21, %c0_22] : memref<2x4x256xf32, #tpu.memory_space<vmem>>, vector<2x4x256xf32>
    tpu.vector_store %arg6[%c0_20, %c0_21, %c0_22], %46 {strides = array<i32>} : memref<2x4x256xf32, #tpu.memory_space<vmem>>, vector<2x4x256xf32>,
    %c0_23 = arith.constant 0 : index
    %c0_24 = arith.constant 0 : index
    %48 = vector.load %arg7[%c0_23, %c0_24] : memref<4x1xf32, #tpu.memory_space<vmem>>, vector<4x1xf32>
    tpu.vector_store %arg7[%c0_23, %c0_24], %25 {strides = array<i32>} : memref<4x1xf32, #tpu.memory_space<vmem>>, vector<4x1xf32>,
    %c0_25 = arith.constant 0 : index
    %c0_26 = arith.constant 0 : index
    %49 = vector.load %arg8[%c0_25, %c0_26] : memref<4x1xf32, #tpu.memory_space<vmem>>, vector<4x1xf32>
    tpu.vector_store %arg8[%c0_25, %c0_26], %29 {strides = array<i32>} : memref<4x1xf32, #tpu.memory_space<vmem>>, vector<4x1xf32>,
    return
  }
  func.func @transform_0(%arg0: i32) -> (i32, i32, i32) {
    %c0_i32 = arith.constant 0 : i32
    %c0_i32_0 = arith.constant 0 : i32
    %c0_i32_1 = arith.constant 0 : i32
    return %c0_i32, %arg0, %c0_i32_0 : i32, i32, i32
  }
  func.func @transform_1(%arg0: i32) -> (i32, i32) {
    %c0_i32 = arith.constant 0 : i32
    %c0_i32_0 = arith.constant 0 : i32
    return %arg0, %c0_i32 : i32, i32
  }
  func.func @transform_2(%arg0: i32) -> (i32, i32) {
    %c0_i32 = arith.constant 0 : i32
    %c0_i32_0 = arith.constant 0 : i32
    return %arg0, %c0_i32 : i32, i32
  }
  func.func @transform_3(%arg0: i32) -> (i32, i32) {
    %c0_i32 = arith.constant 0 : i32
    %c0_i32_0 = arith.constant 0 : i32
    return %arg0, %c0_i32 : i32, i32
  }
  func.func @transform_4(%arg0: i32) -> (i32, i32) {
    %c0_i32 = arith.constant 0 : i32
    %c0_i32_0 = arith.constant 0 : i32
    return %arg0, %c0_i32 : i32, i32
  }
  func.func @transform_5(%arg0: i32) -> (i32, i32, i32) {
    %c0_i32 = arith.constant 0 : i32
    %c0_i32_0 = arith.constant 0 : i32
    %c0_i32_1 = arith.constant 0 : i32
    return %c0_i32, %arg0, %c0_i32_0 : i32, i32, i32
  }
  func.func @transform_6(%arg0: i32) -> (i32, i32) {
    %c0_i32 = arith.constant 0 : i32
    %c0_i32_0 = arith.constant 0 : i32
    return %arg0, %c0_i32 : i32, i32
  }
  func.func @transform_7(%arg0: i32) -> (i32, i32) {
    %c0_i32 = arith.constant 0 : i32
    %c0_i32_0 = arith.constant 0 : i32
    return %arg0, %c0_i32 : i32, i32
  }
}

</mosaic_0001>

<bundles_post_ra>
// kernel: tpu_custom_call.1
= control target key start
LH: loop header
LB: loop body
LE: loop exit
PB: predicated region body
PF: predicated region fallthrough
CT: control target
= control target key end

     0   :  { %v192_v1 = vmov 0   ;;  %s298_s0 = inlined_call_operand.vmem [shape: f32[2,4,256], index: 0, kind: input, shape index: {}]   ;;  %s299_s1 = inlined_call_operand.vmem [shape: f32[4,1], index: 1, kind: input, shape index: {}]   ;;  %s300_s2 = inlined_call_operand.vmem [shape: f32[4,1], index: 2, kind: input, shape index: {}]   ;;  %s301_s3 = inlined_call_operand.vmem [shape: f32[4,1], index: 3, kind: input, shape index: {}]   ;;  %s302_s4 = inlined_call_operand.vmem [shape: f32[4,1], index: 4, kind: input, shape index: {}]   ;;  %s303_s5 = inlined_call_operand.hbm [shape: f32[2,4,256], index: 5, kind: output, shape index: {0}]   ;;  %s304_s6 = inlined_call_operand.vmem [shape: f32[4,1], index: 6, kind: output, shape index: {1}]   ;;  %s305_s7 = inlined_call_operand.vmem [shape: f32[4,1], index: 7, kind: output, shape index: {2}]  }
   0x1   :  { %v26_v0 = vld [vmem:[%s299_s1] sm:$0xf]  ;;  %164 = vset.pattern.permute.xlu0 %v192_v1  ;;  %165 = vset.pattern.permute.xlu1 %v192_v1 }
   0x2   :  { %13 = vsyncpa [#allocation3], 0  ;;  %30 = vperm.xlu0 %164, %v26_v0   ;;  %v193_v2 = vmov 839922192   ;;  %v35_v4 = vlaneseq  ;;  %v245_v9 = vld [vmem:[%s298_s0] sm:$0xff]  ;;  %v250_v10 = vld [vmem:[%s298_s0 + $0x8] sm:$0xff] }
   0x3   :  { %v33_v3 = vunpack.c.l.s4 %v193_v2  ;;  %vm48_vm0 = vcmask 1043456   ;;  %v27_v47 = vld [vmem:[%s300_s2] sm:$0xf]  ;;  %vm132_vm1 = vcmask 3072  }
   0x4   :  { %v36_v6 = vshrl.u32 %v35_v4, 7  ;;  %v97_v54 = vld [vmem:[%s301_s3] sm:$0xf] }
   0x5   :  { %v34_v5 = vunpack.c.0.s8 %v33_v3  ;;  %v100_v59 = vld [vmem:[%s302_s4] sm:$0xf] }
   0x7   :  { %v240_v7 = vsub.s32 %v34_v5, %v36_v6 }
  0x81   :  { %v31_v8 = vpop.permute.xlu0 %30 }
  0x82   :  { %v38_v11 = vrot.slane %v31_v8, %v240_v7 }
  0x84   :  { %v40_v12 = vsub.f32 %v245_v9, %v38_v11  ;;  %v41_v13 = vsub.f32 %v250_v10, %v38_v11 }
  0x86   :  { %v44_v14 = vcombine.high %v40_v12, %v40_v12  ;;  %v45_v15 = vcombine.high %v41_v13, %v41_v13  ;;  %v49_v16 = vsel %vm48_vm0, %v40_v12, 0.0  ;;  %v50_v17 = vsel %vm48_vm0, %v41_v13, 0.0 }
  0x87   :  { %v51_v18 = vadd.f32 %v50_v17, %v49_v16  ;;  %v55_v19 = vmul.f32 %v40_v12, %v40_v12  ;;  %v56_v20 = vmul.f32 %v41_v13, %v41_v13 }
  0x88   :  { %v52_v21 = vsel %vm48_vm0, %v44_v14, 0.0  ;;  %v53_v22 = vsel %vm48_vm0, %v45_v15, 0.0 }
  0x89   :  { %v54_v23 = vadd.f32 %v53_v22, %v52_v21  ;;  %v59_v24 = vcombine.high %v55_v19, %v55_v19  ;;  %v60_v25 = vcombine.high %v56_v20, %v56_v20  ;;  %v69_v26 = vsel %vm48_vm0, %v51_v18, 0.0 }
  0x8a   :  { %v63_v27 = vsel %vm48_vm0, %v55_v19, 0.0  ;;  %v64_v28 = vsel %vm48_vm0, %v56_v20, 0.0 }
  0x8b   :  { %v70_v29 = vsel %vm48_vm0, %v54_v23, 0.0  ;;  %v65_v30 = vadd.f32 %v64_v28, %v63_v27  ;;  %v66_v31 = vsel %vm48_vm0, %v59_v24, 0.0  ;;  %v67_v32 = vsel %vm48_vm0, %v60_v25, 0.0 }
  0x8c   :  { %v71_v33 = vadd.f32 %v70_v29, %v69_v26  ;;  %v68_v34 = vadd.f32 %v67_v32, %v66_v31 }
  0x8d   :  { %v74_v35 = vsel %vm48_vm0, %v65_v30, 0.0 }
  0x8e   :  { %72 = vadd.xlane.f32.xlu0 %v71_v33  ;;  %v75_v36 = vsel %vm48_vm0, %v68_v34, 0.0 }
  0x8f   :  { %v76_v37 = vadd.f32 %v75_v36, %v74_v35 }
  0x91   :  { %77 = vadd.xlane.f32.xlu1 %v76_v37 }
 0x11b   :  { %v73_v38 = vpop.xlane.xlu0 %72 }
 0x11c   :  { %v80_v39 = vmul.f32 0.001953125, %v73_v38 }
 0x11e   :  { %v81_v40 = vmul.f32 512.0, %v80_v39  ;;  %v86_v41 = vadd.f32 %v80_v39, %v26_v0  ;;  %v78_v44 = vpop.xlane.xlu1 %77 }
 0x120   :  { %v87_v42 = vsub.f32 %v86_v41, %v26_v0  ;;  %v82_v43 = vmul.f32 %v81_v40, %v80_v39 }
 0x122   :  { %v88_v45 = vmul.f32 0.1, %v87_v42  ;;  %v83_v46 = vsub.f32 %v78_v44, %v82_v43 }
 0x124   :  { %v89_v48 = vadd.f32 %v88_v45, %v26_v0  ;;  %v85_v49 = vmul.f32 0.0019569471, %v83_v46 }
 0x126   :  { %v90_v50 = vsub.f32 %v85_v49, %v27_v47  ;;  %133 = vst.msk [vmem:[%s304_s6] sm:$0xf] %vm132_vm1, %v89_v48  ;;  %v95_v55 = vsub.f32 0.0, %v89_v48  ;;  %s194_s6 = smov [#allocation2]  }
 0x128   :  { %v91_v51 = vmul.f32 0.1, %v90_v50 }
 0x12a   :  { %v92_v52 = vadd.f32 %v91_v51, %v27_v47 }
 0x12c   :  { %v93_v53 = vadd.f32 1e-09, %v92_v52  ;;  %134 = vst.msk [vmem:[%s305_s7] sm:$0xf] %vm132_vm1, %v92_v52  ;;  %s140_s7 = sshll.u32 %s194_s6, 4  ;;  %s141_s7 = int_to_ptr.vmem [resolvable:$true] %s140_s7 }
 0x12d   :  { %s168_s3 = scalar_lea.vmem %s141_s7, 256  ;;  %p173_p1 = scmp.lt.s32.totalorder %s141_s7, %s141_s7 }
 0x12e   :  { %166 = vrsqrt.f32 %v93_v53  ;;  %p169_p0 = scmp.ne.s32.totalorder %s141_s7, %s168_s3  ;;  %p174_p2 = scmp.lt.s32.totalorder %s168_s3, %s168_s3 }
 0x130   :  { %p175_p3 = por %p174_p2, %p173_p1 }
 0x132   :  { %p176_p4 = pnand %p175_p3, %p169_p0 }
 0x138   :  { %v167_v56 = vpop.eup %166 }
 0x139   :  { %v98_v57 = vmul.f32 %v167_v56, %v97_v54  ;;  %v96_v58 = vmul.f32 %v167_v56, %v95_v55 }
 0x13b   :  { %104 = vperm.xlu1 %165, %v98_v57   ;;  %v99_v60 = vmul.f32 %v97_v54, %v96_v58 }
 0x13d   :  { %v101_v61 = vadd.f32 %v100_v59, %v99_v60 }
 0x13f   :  { %118 = vperm.xlu1 %165, %v101_v61  }
 0x1ba   :  { %v105_v62 = vpop.permute.xlu1 %104 }
 0x1bb   :  { %v112_v63 = vrot.slane %v105_v62, %v240_v7 }
 0x1bd   :  { %v114_v1 = vmul.f32 %v112_v63, %v245_v9  ;;  %v115_v2 = vmul.f32 %v112_v63, %v250_v10 }
 0x1be   :  { %v119_v0 = vpop.permute.xlu1 %118 }
 0x1bf   :  { %v126_v3 = vrot.slane %v119_v0, %v240_v7 }
 0x1c1   :  { %v128_v4 = vadd.f32 %v126_v3, %v114_v1  ;;  %v129_v5 = vadd.f32 %v126_v3, %v115_v2 }
 0x1c3   :  { %130 = vst [vmem:[#allocation2] sm:$0xff] %v128_v4  ;;  %131 = vst [vmem:[#allocation2 + $0x8] sm:$0xff] %v129_v5 }
 0x1c4   :  { %179 = shalt.err (!%p176_p4)
}
 0x1c5   :  { %s180_s15 = scalar_lea.hbm %s303_s5, 256 }
 0x1c6   :  { %p181_p5 = scmp.ne.s32.totalorder %s303_s5, %s180_s15  ;;  %p184_p6 = scmp.lt.u32.totalorder %s180_s15, %s303_s5 }
 0x1c8   :  { %p186_p7 = pnand %p184_p6, %p181_p5 }
 0x1ca   :  { %189 = shalt.err (!%p186_p7)
}
 0x1cb   :  { %s195_s20 = smov 128   ;;  %s196_s21 = smov 8  }
 0x1cc   :  { %146 = dma.vmem_to_hbm [thread:$0]  %s141_s7, 256, %s303_s5, [#allocation3], %s195_s20, %s195_s20, %s196_s21  }
 0x1cd   :  { %190 = dma.done.wait [#allocation3], 256  }
 0x1ce   :  { %191 = vsyncadd [#allocation3], 4294967040 }
 0x1cf   :  { %158 = vsyncpa [#allocation3], 1 }

</bundles_post_ra>
